<compile_context>
chip_gen: v6e
topology: v6e:2x2x1
jax: 0.10.0
libtpu: 0.0.40
codegen_flags: <defaults>
</compile_context>

<pallas_src>
import jax
import jax.numpy as jnp
from jax.experimental import pallas as pl
from jax.experimental.pallas import tpu as pltpu


# ----------------------------------------------------------------------------
# Model configuration (mirrors AutoEncoder(inchannel=4, hidden_layers=(8,16),
# latent_chan=4))
# ----------------------------------------------------------------------------
IN_CH = 4
HIDDEN = (8, 16)
LATENT = 4

MAX_CH = max(IN_CH, LATENT, *HIDDEN)      # 16 — padded weight tile size
NUM_W = 6

# Channel chain:
#   encode:  4 -> 8 (tanh) -> 16 (tanh)
#   latent:  16 -> 4 (tanh)                    [latent output]
#   deconv:  4 -> 16 (tanh)                    (activation because len(hidden) > 0)
#   decode:  16 -> 8 (tanh) -> 4 (NO activation: decode conv built at i == 0)
_W_LAYOUT = (
    ("w_e0",   HIDDEN[0], IN_CH),      # 4  -> 8   (tanh)
    ("w_e1",   HIDDEN[1], HIDDEN[0]),  # 8  -> 16  (tanh)
    ("w_lat",  LATENT,    HIDDEN[1]),  # 16 -> 4   (tanh)   latent
    ("w_latd", HIDDEN[1], LATENT),     # 4  -> 16  (tanh)
    ("w_d1",   HIDDEN[0], HIDDEN[1]),  # 16 -> 8   (tanh)
    ("w_d0",   IN_CH,     HIDDEN[0]),  # 8  -> 4   (no activation)
)


def _init_weight(key, cout, cin):
    """Deterministic stand-in for PyTorch Conv2d default init (kaiming-uniform
    for a 1x1 kernel reduces to U(-1/sqrt(cin), 1/sqrt(cin))).  Stored as
    (Cout, Cin) so that y = W @ x for x: (Cin, pixels)."""
    bound = 1.0 / jnp.sqrt(jnp.float32(cin))
    return jax.random.uniform(key, (cout, cin), jnp.float32, -bound, bound)


def make_params(key):
    ks = jax.random.split(key, NUM_W)
    return {name: _init_weight(ks[i], cout, cin)
            for i, (name, cout, cin) in enumerate(_W_LAYOUT)}


def pack_weights(params):
    """Pack the six (Cout, Cin) weights into one zero-padded (6, 16, 16) array."""
    wp = jnp.zeros((NUM_W, MAX_CH, MAX_CH), jnp.float32)
    for i, (name, cout, cin) in enumerate(_W_LAYOUT):
        wp = wp.at[i, :cout, :cin].set(params[name])
    return wp


# ----------------------------------------------------------------------------
# Pallas kernel: full encoder/decoder chain on one (C, tile_hw) pixel slab
# ----------------------------------------------------------------------------
def autoencoder_kernel(x_ref, w_ref, out_ref, lat_ref):
    x = x_ref[...]                                       # (IN_CH, tile_hw) f32

    def mix(idx, cout, cin, v):
        # static slice of the packed weight block; tiny (<= 16x16)
        w = w_ref[idx, :cout, :cin]                      # (cout, cin)
        return jnp.dot(w, v, preferred_element_type=jnp.float32)

    # encode convs (1x1 conv == channel matmul) + tanh
    h = jnp.tanh(mix(0, HIDDEN[0], IN_CH, x))            # (8,  T)
    h = jnp.tanh(mix(1, HIDDEN[1], HIDDEN[0], h))        # (16, T)

    # latent conv + tanh
    lat = jnp.tanh(mix(2, LATENT, HIDDEN[1], h))         # (4,  T)

    # latent deconv + tanh (len(hidden_layers) > 0)
    h = jnp.tanh(mix(3, HIDDEN[1], LATENT, lat))         # (16, T)

    # decode convs (reversed order): 16->8 with tanh, then 8->4 without
    h = jnp.tanh(mix(4, HIDDEN[0], HIDDEN[1], h))        # (8,  T)
    out = mix(5, IN_CH, HIDDEN[0], h)                    # (4,  T)

    out_ref[...] = out.astype(out_ref.dtype)             # lane-dense store
    lat_ref[...] = lat.astype(lat_ref.dtype)             # lane-dense store


# ----------------------------------------------------------------------------
# Wrapper
# ----------------------------------------------------------------------------
def _pick_tile_hw(hw, max_tile=2048):
    """Largest lane-aligned pixel tile that divides H*W (amortizes per-step
    overhead; VMEM footprint is tiny so bigger is always safe)."""
    if hw <= max_tile:
        return hw                     # full row per step (any hw is legal)
    for t in range(max_tile, 127, -128):
        if hw % t == 0:
            return t
    return hw                         # fallback: whole spatial extent per step


def autoencoder_forward(x_nchw, w_packed, *, tile_hw=None):
    """x_nchw: (N, C, H, W) float32. Returns (output NCHW, latent NCHW)."""
    N, C, H, W = x_nchw.shape
    assert C == IN_CH
    HW = H * W
    if tile_hw is None:
        tile_hw = _pick_tile_hw(HW)
    assert HW % tile_hw == 0, "tile_hw must divide H*W"
    assert tile_hw % 128 == 0 or tile_hw == HW, "tile_hw must be lane-aligned"

    # NCHW -> (N, C, H*W): a free reshape, no transpose / extra HBM traffic.
    x3 = x_nchw.reshape(N, C, HW)

    grid = (N, HW // tile_hw)

    out3, lat3 = pl.pallas_call(
        autoencoder_kernel,
        out_shape=(
            jax.ShapeDtypeStruct((N, IN_CH, HW), jnp.float32),
            jax.ShapeDtypeStruct((N, LATENT, HW), jnp.float32),
        ),
        grid_spec=pltpu.PrefetchScalarGridSpec(
            num_scalar_prefetch=0,
            grid=grid,
            in_specs=[
                # pixels on the lane axis; batch dim squeezed out of the kernel
                pl.BlockSpec((None, IN_CH, tile_hw), lambda n, j: (n, 0, j)),
                # all weights in one tiny resident block (constant index map)
                pl.BlockSpec((NUM_W, MAX_CH, MAX_CH), lambda n, j: (0, 0, 0)),
            ],
            out_specs=[
                pl.BlockSpec((None, IN_CH, tile_hw), lambda n, j: (n, 0, j)),
                pl.BlockSpec((None, LATENT, tile_hw), lambda n, j: (n, 0, j)),
            ],
        ),
        compiler_params=pltpu.CompilerParams(
            dimension_semantics=("parallel", "parallel")),
    )(x3, w_packed)

    out = out3.reshape(N, IN_CH, H, W)
    lat = lat3.reshape(N, LATENT, H, W)
    return out, lat


# ----------------------------------------------------------------------------
# Pure-JAX reference (same math) for a correctness check
# ----------------------------------------------------------------------------
def reference_forward(x_nchw, params):
    N, C, H, W = x_nchw.shape
    x = x_nchw.reshape(N, C, H * W)
    mix = lambda w, v: jnp.einsum("oi,nip->nop", w, v)
    h = jnp.tanh(mix(params["w_e0"], x))
    h = jnp.tanh(mix(params["w_e1"], h))
    lat = jnp.tanh(mix(params["w_lat"], h))
    h = jnp.tanh(mix(params["w_latd"], lat))
    h = jnp.tanh(mix(params["w_d1"], h))
    out = mix(params["w_d0"], h)
    return out.reshape(N, IN_CH, H, W), lat.reshape(N, LATENT, H, W)


if __name__ == "__main__":
    key = jax.random.PRNGKey(0)
    k_params, k_x = jax.random.split(key)

    params = make_params(k_params)
    w_packed = pack_weights(params)
    x = jax.random.normal(k_x, (2, IN_CH, 16, 16), jnp.float32)  # NCHW

    out, latent = autoencoder_forward(x, w_packed)
    out, latent = jax.block_until_ready((out, latent))

    ref_out, ref_lat = reference_forward(x, params)
    assert out.shape == (2, IN_CH, 16, 16)
    assert latent.shape == (2, LATENT, 16, 16)
    assert jnp.allclose(out, ref_out, atol=1e-5, rtol=1e-5)
    assert jnp.allclose(latent, ref_lat, atol=1e-5, rtol=1e-5)

    print("KERNEL_OK")
</pallas_src>

<mosaic_0001>
module attributes {stable_mosaic.version = 11 : i64} {
  func.func @autoencoder_kernel(%arg0: i32, %arg1: i32, %arg2: memref<1x4x256xf32, #tpu.memory_space<vmem>>, %arg3: memref<6x16x16xf32, #tpu.memory_space<vmem>>, %arg4: memref<1x4x256xf32, #tpu.memory_space<vmem>>, %arg5: memref<1x4x256xf32, #tpu.memory_space<vmem>>) attributes {dimension_semantics = [#tpu.dimension_semantics<parallel>, #tpu.dimension_semantics<parallel>], iteration_bounds = array<i64: 2, 1>, scalar_prefetch = 0 : i64, scratch_operands = 0 : i64, tpu.core_type = #tpu.core_type<tc>, window_params = [{transform_indices = @transform_0, window_bounds = array<i64: 1, 4, 256>}, {pipeline_mode = #tpu.pipeline_mode<synchronous>, transform_indices = @transform_1, window_bounds = array<i64: 6, 16, 16>}, {transform_indices = @transform_2, window_bounds = array<i64: 1, 4, 256>}, {transform_indices = @transform_3, window_bounds = array<i64: 1, 4, 256>}]} {
    %c0 = arith.constant 0 : index
    %c0_0 = arith.constant 0 : index
    %c0_1 = arith.constant 0 : index
    %0 = vector.load %arg2[%c0, %c0_0, %c0_1] : memref<1x4x256xf32, #tpu.memory_space<vmem>>, vector<1x4x256xf32>
    %1 = vector.shape_cast %0 : vector<1x4x256xf32> to vector<4x256xf32>
    %c0_2 = arith.constant 0 : index
    %c0_3 = arith.constant 0 : index
    %c0_4 = arith.constant 0 : index
    %2 = vector.load %arg3[%c0_2, %c0_3, %c0_4] : memref<6x16x16xf32, #tpu.memory_space<vmem>>, vector<1x8x4xf32>
    %3 = vector.shape_cast %2 : vector<1x8x4xf32> to vector<8x4xf32>
    %cst = arith.constant dense<0.000000e+00> : vector<8x256xf32>
    %4 = tpu.matmul %3, %1, %cst {dimension_numbers = #tpu.dot_dimension_numbers<[1], [0], [0], [1], [0, 0, 1, 1], [], []>} : vector<8x4xf32>, vector<4x256xf32>, vector<8x256xf32> -> vector<8x256xf32>
    %5 = math.tanh %4 : vector<8x256xf32>
    %c1 = arith.constant 1 : index
    %c0_5 = arith.constant 0 : index
    %c0_6 = arith.constant 0 : index
    %6 = vector.load %arg3[%c1, %c0_5, %c0_6] : memref<6x16x16xf32, #tpu.memory_space<vmem>>, vector<1x16x8xf32>
    %7 = vector.shape_cast %6 : vector<1x16x8xf32> to vector<16x8xf32>
    %cst_7 = arith.constant dense<0.000000e+00> : vector<16x256xf32>
    %8 = tpu.matmul %7, %5, %cst_7 {dimension_numbers = #tpu.dot_dimension_numbers<[1], [0], [0], [1], [0, 0, 1, 1], [], []>} : vector<16x8xf32>, vector<8x256xf32>, vector<16x256xf32> -> vector<16x256xf32>
    %9 = math.tanh %8 : vector<16x256xf32>
    %c2 = arith.constant 2 : index
    %c0_8 = arith.constant 0 : index
    %c0_9 = arith.constant 0 : index
    %10 = vector.load %arg3[%c2, %c0_8, %c0_9] : memref<6x16x16xf32, #tpu.memory_space<vmem>>, vector<1x4x16xf32>
    %11 = vector.shape_cast %10 : vector<1x4x16xf32> to vector<4x16xf32>
    %cst_10 = arith.constant dense<0.000000e+00> : vector<4x256xf32>
    %12 = tpu.matmul %11, %9, %cst_10 {dimension_numbers = #tpu.dot_dimension_numbers<[1], [0], [0], [1], [0, 0, 1, 1], [], []>} : vector<4x16xf32>, vector<16x256xf32>, vector<4x256xf32> -> vector<4x256xf32>
    %13 = math.tanh %12 : vector<4x256xf32>
    %c3 = arith.constant 3 : index
    %c0_11 = arith.constant 0 : index
    %c0_12 = arith.constant 0 : index
    %14 = vector.load %arg3[%c3, %c0_11, %c0_12] : memref<6x16x16xf32, #tpu.memory_space<vmem>>, vector<1x16x4xf32>
    %15 = vector.shape_cast %14 : vector<1x16x4xf32> to vector<16x4xf32>
    %cst_13 = arith.constant dense<0.000000e+00> : vector<16x256xf32>
    %16 = tpu.matmul %15, %13, %cst_13 {dimension_numbers = #tpu.dot_dimension_numbers<[1], [0], [0], [1], [0, 0, 1, 1], [], []>} : vector<16x4xf32>, vector<4x256xf32>, vector<16x256xf32> -> vector<16x256xf32>
    %17 = math.tanh %16 : vector<16x256xf32>
    %c4 = arith.constant 4 : index
    %c0_14 = arith.constant 0 : index
    %c0_15 = arith.constant 0 : index
    %18 = vector.load %arg3[%c4, %c0_14, %c0_15] : memref<6x16x16xf32, #tpu.memory_space<vmem>>, vector<1x8x16xf32>
    %19 = vector.shape_cast %18 : vector<1x8x16xf32> to vector<8x16xf32>
    %cst_16 = arith.constant dense<0.000000e+00> : vector<8x256xf32>
    %20 = tpu.matmul %19, %17, %cst_16 {dimension_numbers = #tpu.dot_dimension_numbers<[1], [0], [0], [1], [0, 0, 1, 1], [], []>} : vector<8x16xf32>, vector<16x256xf32>, vector<8x256xf32> -> vector<8x256xf32>
    %21 = math.tanh %20 : vector<8x256xf32>
    %c5 = arith.constant 5 : index
    %c0_17 = arith.constant 0 : index
    %c0_18 = arith.constant 0 : index
    %22 = vector.load %arg3[%c5, %c0_17, %c0_18] : memref<6x16x16xf32, #tpu.memory_space<vmem>>, vector<1x4x8xf32>
    %23 = vector.shape_cast %22 : vector<1x4x8xf32> to vector<4x8xf32>
    %cst_19 = arith.constant dense<0.000000e+00> : vector<4x256xf32>
    %24 = tpu.matmul %23, %21, %cst_19 {dimension_numbers = #tpu.dot_dimension_numbers<[1], [0], [0], [1], [0, 0, 1, 1], [], []>} : vector<4x8xf32>, vector<8x256xf32>, vector<4x256xf32> -> vector<4x256xf32>
    %c0_20 = arith.constant 0 : index
    %c0_21 = arith.constant 0 : index
    %c0_22 = arith.constant 0 : index
    %25 = vector.load %arg4[%c0_20, %c0_21, %c0_22] : memref<1x4x256xf32, #tpu.memory_space<vmem>>, vector<1x4x256xf32>
    %26 = vector.shape_cast %25 : vector<1x4x256xf32> to vector<4x256xf32>
    %27 = vector.shape_cast %24 : vector<4x256xf32> to vector<1x4x256xf32>
    tpu.vector_store %arg4[%c0_20, %c0_21, %c0_22], %27 {strides = array<i32>} : memref<1x4x256xf32, #tpu.memory_space<vmem>>, vector<1x4x256xf32>,
    %c0_23 = arith.constant 0 : index
    %c0_24 = arith.constant 0 : index
    %c0_25 = arith.constant 0 : index
    %28 = vector.load %arg5[%c0_23, %c0_24, %c0_25] : memref<1x4x256xf32, #tpu.memory_space<vmem>>, vector<1x4x256xf32>
    %29 = vector.shape_cast %28 : vector<1x4x256xf32> to vector<4x256xf32>
    %30 = vector.shape_cast %13 : vector<4x256xf32> to vector<1x4x256xf32>
    tpu.vector_store %arg5[%c0_23, %c0_24, %c0_25], %30 {strides = array<i32>} : memref<1x4x256xf32, #tpu.memory_space<vmem>>, vector<1x4x256xf32>,
    return
  }
  func.func @transform_0(%arg0: i32, %arg1: i32) -> (i32, i32, i32) {
    %c0_i32 = arith.constant 0 : i32
    %c0_i32_0 = arith.constant 0 : i32
    return %arg0, %c0_i32, %arg1 : i32, i32, i32
  }
  func.func @transform_1(%arg0: i32, %arg1: i32) -> (i32, i32, i32) {
    %c0_i32 = arith.constant 0 : i32
    %c0_i32_0 = arith.constant 0 : i32
    %c0_i32_1 = arith.constant 0 : i32
    %c0_i32_2 = arith.constant 0 : i32
    return %c0_i32, %c0_i32_0, %c0_i32_1 : i32, i32, i32
  }
  func.func @transform_2(%arg0: i32, %arg1: i32) -> (i32, i32, i32) {
    %c0_i32 = arith.constant 0 : i32
    %c0_i32_0 = arith.constant 0 : i32
    return %arg0, %c0_i32, %arg1 : i32, i32, i32
  }
  func.func @transform_3(%arg0: i32, %arg1: i32) -> (i32, i32, i32) {
    %c0_i32 = arith.constant 0 : i32
    %c0_i32_0 = arith.constant 0 : i32
    return %arg0, %c0_i32, %arg1 : i32, i32, i32
  }
}

</mosaic_0001>

<bundles_post_ra>
// kernel: tpu_custom_call.1
= control target key start
LH: loop header
LB: loop body
LE: loop exit
PB: predicated region body
PF: predicated region fallthrough
CT: control target
= control target key end

     0   :  { %9 = vsyncpa [#allocation3], 0  ;;  %s1476_s0 = inlined_call_operand.hbm [shape: f32[2,4,256], index: 0, kind: input, shape index: {}]   ;;  %s1477_s1 = inlined_call_operand.hbm [shape: f32[6,16,16], index: 1, kind: input, shape index: {}]   ;;  %s1478_s2 = inlined_call_operand.hbm [shape: f32[2,4,256], index: 2, kind: output, shape index: {0}]   ;;  %s1479_s3 = inlined_call_operand.hbm [shape: f32[2,4,256], index: 3, kind: output, shape index: {1}]  }
   0x1   :  { %11 = vsyncpa [#allocation3 + $0x1], 0 }
   0x2   :  { %12 = vsyncpa [#allocation6], 0 }
   0x3   :  { %13 = vsyncpa [#allocation4], 0 }
   0x4   :  { %15 = vsyncpa [#allocation4 + $0x1], 0 }
   0x5   :  { %16 = vsyncpa [#allocation9], 0 }
   0x6   :  { %18 = vsyncpa [#allocation9 + $0x1], 0  ;;  %s1260_s12 = smov 0   ;;  %s1262_s13 = smov 0  }
   0x7   :  { %s1264_s14 = smov 0   ;;  %s1266_s15 = smov 0  }
   0x8   :  { %s1268_s16 = smov 0   ;;  %s1270_s17 = smov 0  }
   0x9 LB: > { %s917_s18 = sadd.s32 4294967295, %s1231_s17   ;;  %s918_s19 = sadd.s32 4294967294, %s1231_s17   ;;  %s1231_s17 = sphi %s1270_s17, %s24_s17   ;;  %s1227_s16 = sphi %s1268_s16, %s1497_s16   ;;  %s1223_s15 = sphi %s1266_s15, %s1496_s15   ;;  %s1219_s14 = sphi %s1264_s14, %s1495_s14   ;;  %s1215_s13 = sphi %s1262_s13, %s1494_s13   ;;  %s1211_s12 = sphi %s1260_s12, %s1493_s12  }
   0xa   : > { %p58_p0 = scmp.ne.s32.totalorder %s1215_s13, %s1211_s12  ;;  %p1294_p1 = scmp.eq.s32.totalorder %s917_s18, 0 }
   0xb   : > { %p1298_p2 = scmp.eq.s32.totalorder %s917_s18, 1  ;;  %p111_p3 = scmp.eq.s32.totalorder %s918_s19, 1 }
   0xc   : > { %p1304_p4 = por %p1294_p1, %p58_p0  ;;  %p919_p5 = scmp.ge.s32.totalorder %s1231_s17, 1 }
   0xd   : > { %p1309_p6 = por %p111_p3, %p58_p0  ;;  %p146_p7 = scmp.lt.s32.totalorder %s1231_s17, 3 }
   0xe   : > { %s1483_s22 = scalar_select %p1304_p4, 1, 0 }
   0xf   : > { %s1484_s23 = scalar_select %p1309_p6, 1, 0 }
  0x10   : > { %p1314_p8 = pnand %p919_p5, %p146_p7  ;;  %s1233_s25 = smov [#allocation5]  }
  0x11   : > { %s158_s26 = sshll.u32 %s1233_s25, 4  ;;  %s36_s28 = sadd.s32 1, %s1227_s16  ;;  %s159_s26 = int_to_ptr.vmem [resolvable:$true] %s158_s26 }
  0x12   : > { %p963_p9 = pneg %p1314_p8  ;;  %s1074_s29 = scalar_lea.vmem %s159_s26, 1536 }
  0x13   : > { %p1075_p13 = scmp.ne.s32.totalorder %s159_s26, %s1074_s29  ;;  %p1082_p5 = scmp.lt.s32.totalorder %s159_s26, %s159_s26 }
  0x14   : > { %p1323_p11 = pnand %p963_p9, %p1294_p1  ;;  %p1083_p7 = scmp.lt.s32.totalorder %s1074_s29, %s1074_s29 }
  0x16   : > { %p1065_p12 = pneg %p1323_p11  ;;  %p1084_p6 = por %p1083_p7, %p1082_p5 }
  0x18   : > { %p1077_p0 = pnand %p1075_p13, %p1065_p12 }
  0x1a   : > { %p1078_p3 = pneg %p1077_p0 }
  0x1c   : > { %p1085_p4 = pnand %p1084_p6, %p1078_p3 }
  0x1e   : > { %1088 = shalt.err (!%p1085_p4)
}
  0x1f   : > { %s1234_s30 = smov 128   ;;  %s1235_s4 = smov 8  }
  0x20   : > { %966 = dma.hbm_to_vmem [thread:$0]  (!%p1323_p11), %s1477_s1, 1536, %s159_s26, [#allocation6], %s1234_s30, %s1234_s30, %s1235_s4  }
  0x21   : > { %p38_p6 = scmp.ge.s32.totalorder %s36_s28, 2  ;;  %s45_s7 = sadd.s32 1, %s1219_s14 }
  0x22   : > { %p52_p4 = scmp.ne.s32.totalorder %s1219_s14, %s1215_s13  ;;  %p53_p9 = scmp.eq.s32.totalorder %s1231_s17, 0 }
  0x23   : > { %s1499_s28 = smov (%p38_p6, %s36_s28), 0  ;;  %p979_p0 = scmp.lt.s32.totalorder %s1231_s17, 2 }
  0x24   : > { %p1341_p12 = por %p53_p9, %p52_p4  ;;  %p1347_p13 = por %p1298_p2, %p52_p4 }
  0x25   : > { %s40_s10 = ssub.s32 %s1227_s16, %s1499_s28  ;;  %s172_s11 = sand.u32 1, %s1219_s14  }
  0x26   : > { %p43_p11 = scmp.eq.s32.totalorder %s40_s10, 0  ;;  %s922_s18 = sshll.u32 %s172_s11, 3 }
  0x27   : > { %s950_s25 = sshll.u32 %s1227_s16, 7  ;;  %s176_s30 = scalar_lea.vmem [#allocation2], %s922_s18 }
  0x28   : > { %s1356_s19 = scalar_select %p43_p11, %s1219_s14, %s45_s7  }
  0x29   : > { %s184_s29 = scalar_lea.hbm %s1476_s0, %s950_s25  ;;  %s186_s4 = sshll.u32 %s176_s30, 4  ;;  %s187_s4 = int_to_ptr.vmem [resolvable:$true] %s186_s4 }
  0x2a   : > { %p1364_p2 = pnand %p979_p0, %p1341_p12  ;;  %s173_s5 = scalar_lea.sflag [#allocation3], %s172_s11 }
  0x2b   : > { %s1102_s6 = scalar_lea.vmem %s187_s4, 128  ;;  %s1236_s7 = smov [#allocation2]  }
  0x2c   : > { %p1091_p3 = pneg %p1364_p2  ;;  %p1103_p5 = scmp.ne.s32.totalorder %s187_s4, %s1102_s6 }
  0x2d   : > { %s1107_s10 = sshll.u32 %s1236_s7, 4  ;;  %s1108_s10 = int_to_ptr.vmem [resolvable:$false] %s1107_s10 }
  0x2e   : > { %p1105_p7 = pnand %p1103_p5, %p1091_p3  ;;  %s1109_s25 = scalar_lea.vmem %s1108_s10, 256 }
  0x2f   : > { %p1110_p4 = scmp.lt.s32.totalorder %s187_s4, %s1108_s10  ;;  %p1111_p9 = scmp.lt.s32.totalorder %s1109_s25, %s1102_s6 }
  0x30   : > { %p1106_p6 = pneg %p1105_p7 }
  0x31   : > { %p1112_p11 = por %p1111_p9, %p1110_p4 }
  0x33   : > { %p1113_p10 = pnand %p1112_p11, %p1106_p6 }
  0x35   : > { %1116 = shalt.err (!%p1113_p10)
}
  0x36   : > { %970 = dma.hbm_to_vmem [thread:$0]  (!%p1364_p2), %s184_s29, 128, %s187_s4, %s173_s5  }
  0x37   : > { %195 = sbr.rel (%p1314_p8) target bundleno = 1345 (0x541), region = 28  ;;  %s1375_s8 = sand.u32 (!%p1314_p8), 1, %s1215_s13  }
  0x38   : > { %s1378_s11 = sshll.u32 (!%p1314_p8), %s1375_s8, 3  ;;  %s198_s18 = scalar_lea.sflag (!%p1314_p8), [#allocation3], %s1375_s8 }
  0x39   : > { %s201_s26 = scalar_lea.vmem (!%p1314_p8), [#allocation2], %s1378_s11  ;;  %p1490_p12 = scmp.ne.s32.totalorder (!%p1314_p8), %s1483_s22, 0 }
  0x3c   : > { %1194 = dma.done.wait (%p1490_p12), %s198_s18, 128  }
  0x3d   : > { %1196 = vsyncadd (%p1490_p12), %s198_s18, 4294967168 }
  0x3e   : > { %1198 = dma.done.wait (%p1294_p1), [#allocation6], 1536  }
  0x3f   : > { %1200 = vsyncadd (%p1294_p1), [#allocation6], 4294965760  ;;  %v1237_v0 = vmov 0.0   ;;  %v236_v1 = vld [vmem:[%s201_s26] sm:$0xff]  ;;  %vm244_vm0 = vcmask 1043456   ;;  %v237_v3 = vld [vmem:[#allocation5] sm:$0xff] }
  0x40   : > { %313 = vmatprep.mubr.f32.mxu0 %v1237_v0  ;;  %396 = vmatprep.mubr.f32.mxu1 %v1237_v0  ;;  %v239_v2 = vcombine.high %v236_v1, %v236_v1  ;;  %vm240_vm1 = vcmask 31744   ;;  %v323_v7 = vld [vmem:[#allocation5 + $0x10] sm:$0xff]  ;;  %vm325_vm2 = vcmask 64512   ;;  %v324_v9 = vld [vmem:[#allocation5 + $0x18] sm:$0xff]  ;;  %v414_v17 = vld [vmem:[#allocation5 + $0x20] sm:$0xf] }
  0x41   : > { %vm415_vm3 = vcmask 130048   ;;  %v493_v23 = vld [vmem:[#allocation5 + $0x30] sm:$0xff]  ;;  %s232_s20 = scalar_lea.vmem [#allocation8], %s1378_s11  ;;  %v494_v25 = vld [vmem:[#allocation5 + $0x38] sm:$0xff]  ;;  %v589_v33 = vld [vmem:[#allocation5 + $0x40] sm:$0xff]  ;;  %s951_s22 = sshll.u32 %s1223_s15, 7 }
  0x42   : > { %930 = vmatprep.subr.msk.mxu0 %vm244_vm0, %v239_v2  ;;  %v667_v38 = vld [vmem:[#allocation5 + $0x50] sm:$0xf]  ;;  %s786_s29 = scalar_lea.hbm %s1479_s3, %s951_s22  ;;  %s788_s30 = sshll.u32 %s232_s20, 4  ;;  %s789_s30 = int_to_ptr.vmem [resolvable:$true] %s788_s30 }
  0x43   : > { %931 = vmatpush1.msk.msra.mxu0 %vm244_vm0, %v236_v1  ;;  %s756_s4 = scalar_lea.sflag [#allocation9], %s1375_s8  ;;  %s1117_s21 = scalar_lea.vmem %s789_s30, 128 }
  0x44   : > { %932 = vmatmul.mubr.msk.f32.vlgmr.msra.gmra.mxu0 %vm240_vm1, %v237_v3  ;;  %p1118_p1 = scmp.ne.s32.totalorder %s789_s30, %s1117_s21  ;;  %s1238_s5 = smov [#allocation8]  }
  0x45   : > { %483 = vmatprep.mubr.f32.mxu0 %v1237_v0  ;;  %s1121_s6 = sshll.u32 %s1238_s5, 4  ;;  %s1122_s6 = int_to_ptr.vmem [resolvable:$false] %s1121_s6 }
  0x46   : > { %p1119_p8 = pnand %p1118_p1, %p1347_p13  ;;  %s1123_s7 = scalar_lea.vmem %s1122_s6, 256 }
  0x47   : > { %p1124_p0 = scmp.lt.s32.totalorder %s789_s30, %s1122_s6  ;;  %p1125_p2 = scmp.lt.s32.totalorder %s1123_s7, %s1117_s21 }
  0x48   : > { %p1120_p10 = pneg %p1119_p8 }
  0x49   : > { %p1126_p3 = por %p1125_p2, %p1124_p0 }
  0x4b   : > { %p1127_p5 = pnand %p1126_p3, %p1120_p10 }
 0x104   : > { %v315_v4 = vpop.f32.mrf.mxu0 }
 0x106   : > { %v317_v5 = vpop.f32.mrf.mxu0 }
 0x107   : > { %1035 = vtanh.f32 %v317_v5 }
 0x108   : > { %1037 = vtanh.f32 %v315_v4 }
 0x114   : > { %v1036_v6 = vpop.eup %1035 }
 0x115   : > { %v1038_v8 = vpop.eup %1037  ;;  %362 = vmatprep.subr.mxu1 %v1036_v6 }
 0x116   : > { %363 = vmatpush1.msra.mxu1 %v1038_v8 }
 0x117   : > { %933 = vmatmul.mubr.msk.f32.vlgmr.msra.gmra.mxu1 %vm325_vm2, %v323_v7 }
 0x118   : > { %402 = vmatprep.mubr.f32.mxu1 %v1237_v0 }
 0x11b   : > { %934 = vmatmul.mubr.msk.f32.gmra.mxu1 %vm325_vm2, %v324_v9 }
 0x11c   : > { %657 = vmatprep.mubr.f32.mxu1 %v1237_v0 }
 0x1d7   : > { %v398_v10 = vpop.f32.mrf.mxu1 }
 0x1d9   : > { %v400_v11 = vpop.f32.mrf.mxu1 }
 0x1db   : > { %v404_v12 = vpop.f32.mrf.mxu1 }
 0x1dd   : > { %v406_v13 = vpop.f32.mrf.mxu1 }
 0x1de   : > { %1039 = vtanh.f32 %v406_v13 }
 0x1df   : > { %1041 = vtanh.f32 %v404_v12 }
 0x1e0   : > { %1043 = vtanh.f32 %v400_v11 }
 0x1e1   : > { %1045 = vtanh.f32 %v398_v10 }
 0x1eb   : > { %v1040_v14 = vpop.eup %1039 }
 0x1ec   : > { %v1042_v15 = vpop.eup %1041  ;;  %447 = vmatprep.subr.mxu0 %v1040_v14 }
 0x1ed   : > { %v1044_v16 = vpop.eup %1043  ;;  %448 = vmatpush1.msra.mxu0 %v1042_v15 }
 0x1ee   : > { %v1046_v18 = vpop.eup %1045  ;;  %449 = vmatprep.subr.mxu0 %v1044_v16 }
 0x1ef   : > { %450 = vmatpush1.msra.mxu0 %v1046_v18 }
 0x1f0   : > { %935 = vmatmul.mubr.msk.f32.vlgmr.msra.gmra.mxu0 %vm415_vm3, %v414_v17 }
 0x1f1   : > { %571 = vmatprep.mubr.f32.mxu0 %v1237_v0 }
 0x2b0   : > { %v485_v19 = vpop.f32.mrf.mxu0 }
 0x2b1   : > { %1047 = vtanh.f32 %v485_v19 }
 0x2b2   : > { %v487_v20 = vpop.f32.mrf.mxu0 }
 0x2b3   : > { %1049 = vtanh.f32 %v487_v20 }
 0x2be   : > { %v1048_v21 = vpop.eup %1047 }
 0x2c0   : > { %v1050_v22 = vpop.eup %1049 }
 0x2c1   : > { %936 = vmatprep.subr.msk.mxu0 %vm244_vm0, %v1050_v22  ;;  %v747_v24 = vcombine.low %v1048_v21, %v1050_v22 }
 0x2c2   : > { %937 = vmatpush1.msk.msra.mxu0 %vm244_vm0, %v1048_v21 }
 0x2c3   : > { %938 = vmatmul.mubr.msk.f32.vlgmr.msra.gmra.mxu0 %vm240_vm1, %v493_v23  ;;  %749 = vst [vmem:[%s232_s20] sm:$0xff] %v747_v24 }
 0x2c4   : > { %577 = vmatprep.mubr.f32.mxu0 %v1237_v0 }
 0x2c7   : > { %939 = vmatmul.mubr.msk.f32.gmra.mxu0 %vm240_vm1, %v494_v25 }
 0x383   : > { %v573_v26 = vpop.f32.mrf.mxu0 }
 0x385   : > { %v575_v27 = vpop.f32.mrf.mxu0 }
 0x387   : > { %v579_v28 = vpop.f32.mrf.mxu0 }
 0x389   : > { %v581_v29 = vpop.f32.mrf.mxu0 }
 0x38a   : > { %1051 = vtanh.f32 %v581_v29 }
 0x38b   : > { %1053 = vtanh.f32 %v579_v28 }
 0x38c   : > { %1055 = vtanh.f32 %v575_v27 }
 0x38d   : > { %1057 = vtanh.f32 %v573_v26 }
 0x397   : > { %v1052_v30 = vpop.eup %1051 }
 0x398   : > { %v1054_v31 = vpop.eup %1053  ;;  %621 = vmatprep.subr.mxu1 %v1052_v30 }
 0x399   : > { %v1056_v32 = vpop.eup %1055  ;;  %622 = vmatpush1.msra.mxu1 %v1054_v31 }
 0x39a   : > { %v1058_v34 = vpop.eup %1057  ;;  %623 = vmatprep.subr.mxu1 %v1056_v32 }
 0x39b   : > { %624 = vmatpush1.msra.mxu1 %v1058_v34 }
 0x39c   : > { %940 = vmatmul.mubr.msk.f32.vlgmr.msra.gmra.mxu1 %vm415_vm3, %v589_v33 }
 0x39d   : > { %735 = vmatprep.mubr.f32.mxu1 %v1237_v0 }
 0x45c   : > { %v659_v35 = vpop.f32.mrf.mxu1 }
 0x45e   : > { %v661_v36 = vpop.f32.mrf.mxu1 }
 0x45f   : > { %1059 = vtanh.f32 %v661_v36 }
 0x460   : > { %1061 = vtanh.f32 %v659_v35 }
 0x46c   : > { %v1060_v37 = vpop.eup %1059 }
 0x46d   : > { %v1062_v39 = vpop.eup %1061  ;;  %701 = vmatprep.subr.mxu1 %v1060_v37 }
 0x46e   : > { %702 = vmatpush1.msra.mxu1 %v1062_v39 }
 0x46f   : > { %941 = vmatmul.mubr.msk.f32.vlgmr.msra.gmra.mxu1 %vm325_vm2, %v667_v38 }
 0x470   : > { %1130 = shalt.err (!%p1127_p5)
}
 0x471   : > { %s1131_s10 = scalar_lea.hbm %s786_s29, 128  ;;  %s1135_s26 = scalar_lea.hbm %s1479_s3, 256 }
 0x472   : > { %p1132_p7 = scmp.ne.s32.totalorder %s786_s29, %s1131_s10  ;;  %p1136_p9 = scmp.lt.s32.totalorder %s786_s29, %s1479_s3 }
 0x473   : > { %p1137_p11 = scmp.lt.s32.totalorder %s1135_s26, %s1131_s10 }
 0x474   : > { %p1133_p6 = pnand %p1132_p7, %p1347_p13 }
 0x475   : > { %p1138_p12 = por %p1137_p11, %p1136_p9 }
 0x476   : > { %p1134_p4 = pneg %p1133_p6 }
 0x478   : > { %p1139_p1 = pnand %p1138_p12, %p1134_p4 }
 0x47a   : > { %1142 = shalt.err (!%p1139_p1)
}
 0x47b   : > { %960 = dma.vmem_to_hbm [thread:$0]  (%p1347_p13), %s789_s30, 128, %s786_s29, %s756_s4  }
 0x47c   : > { %s225_s27 = scalar_lea.vmem [#allocation7], %s1378_s11  ;;  %s770_s7 = scalar_lea.hbm %s1478_s2, %s951_s22 }
 0x47d   : > { %s772_s21 = sshll.u32 %s225_s27, 4  ;;  %s751_s10 = scalar_lea.sflag [#allocation4], %s1375_s8  ;;  %s773_s21 = int_to_ptr.vmem [resolvable:$true] %s772_s21 }
 0x47e   : > { %s1143_s25 = scalar_lea.vmem %s773_s21, 128  ;;  %s1239_s18 = smov [#allocation7]  }
 0x47f   : > { %p1144_p8 = scmp.ne.s32.totalorder %s773_s21, %s1143_s25  ;;  %s1147_s29 = sshll.u32 %s1239_s18, 4  ;;  %s1148_s29 = int_to_ptr.vmem [resolvable:$false] %s1147_s29 }
 0x480   : > { %s1149_s11 = scalar_lea.vmem %s1148_s29, 256  ;;  %p1150_p2 = scmp.lt.s32.totalorder %s773_s21, %s1148_s29 }
 0x481   : > { %p1145_p10 = pnand %p1144_p8, %p1347_p13  ;;  %p1151_p3 = scmp.lt.s32.totalorder %s1149_s11, %s1143_s25 }
 0x483   : > { %p1146_p0 = pneg %p1145_p10  ;;  %p1152_p5 = por %p1151_p3, %p1150_p2 }
 0x485   : > { %p1153_p7 = pnand %p1152_p5, %p1146_p0 }
 0x52f   : > { %v737_v40 = vpop.f32.mrf.mxu1 }
 0x531   : > { %v739_v41 = vpop.f32.mrf.mxu1 }
 0x532   : > { %v744_v42 = vcombine.low %v737_v40, %v739_v41 }
 0x534   : > { %746 = vst [vmem:[%s225_s27] sm:$0xff] %v744_v42 }
 0x535   : > { %1156 = shalt.err (!%p1153_p7)
}
 0x536   : > { %s1157_s15 = scalar_lea.hbm %s770_s7, 128  ;;  %s1161_s30 = scalar_lea.hbm %s1478_s2, 256 }
 0x537   : > { %p1158_p6 = scmp.ne.s32.totalorder %s770_s7, %s1157_s15  ;;  %p1162_p11 = scmp.lt.s32.totalorder %s770_s7, %s1478_s2 }
 0x538   : > { %p1163_p12 = scmp.lt.s32.totalorder %s1161_s30, %s1157_s15 }
 0x539   : > { %p1159_p4 = pnand %p1158_p6, %p1347_p13 }
 0x53a   : > { %p1164_p1 = por %p1163_p12, %p1162_p11 }
 0x53b   : > { %p1160_p9 = pneg %p1159_p4 }
 0x53d   : > { %p1165_p8 = pnand %p1164_p1, %p1160_p9 }
 0x53f   : > { %1168 = shalt.err (!%p1165_p8)
}
 0x540   : > { %959 = dma.vmem_to_hbm [thread:$0]  (%p1347_p13), %s773_s21, 128, %s770_s7, %s751_s10  }
 0x541 PF: > { %s800_s20 = sand.u32 1, %s1211_s12   ;;  %p1491_p10 = scmp.ne.s32.totalorder %s1484_s23, 0 }
 0x542   : > { %p1492_p0 = scmp.ge.s32.totalorder %s1231_s17, 2  ;;  %s801_s24 = scalar_lea.sflag [#allocation4], %s800_s20 }
 0x544   : > { %p972_p2 = pnand %p1492_p0, %p1491_p10 }
 0x546   : > { %p973_p3 = pneg %p972_p2 }
 0x548   : > { %1202 = dma.done.wait (%p973_p3), %s801_s24, 128  }
 0x549   : > { %1204 = vsyncadd (%p973_p3), %s801_s24, 4294967168  ;;  %s810_s27 = scalar_lea.sflag [#allocation9], %s800_s20 }
 0x54a   : > { %1206 = dma.done.wait (%p973_p3), %s810_s27, 128  }
 0x54b   : > { %1208 = vsyncadd (%p973_p3), %s810_s27, 4294967168  ;;  %s24_s17 = sadd.s32 1, %s1231_s17   ;;  %s1493_s12 = smov %s1215_s13 }
 0x54c   : > { %p21_p5 = scmp.ge.s32.totalorder %s24_s17, 4   ;;  %s1494_s13 = smov %s1219_s14 }
 0x54d   : > { %s1495_s14 = smov %s1356_s19  ;;  %s1496_s15 = smov %s1227_s16 }
 0x54e   : > { %s1497_s16 = smov %s1499_s28  ;;  %23 = sbr.rel (!%p21_p5) target bundleno = 9 (0x9), region = 99 }
 0x553   :  { %815 = vsyncpa [#allocation3], 1 }
 0x554   :  { %817 = vsyncpa [#allocation3 + $0x1], 1 }
 0x555   :  { %818 = vsyncpa [#allocation6], 1 }
 0x556   :  { %819 = vsyncpa [#allocation4], 1 }
 0x557   :  { %821 = vsyncpa [#allocation4 + $0x1], 1 }
 0x558   :  { %822 = vsyncpa [#allocation9], 1 }
 0x559   :  { %824 = vsyncpa [#allocation9 + $0x1], 1 }

</bundles_post_ra>
